<compile_context>
chip_gen: v7x
topology: tpu7x:2x2x1
jax: 0.10.0
libtpu: 0.0.40
codegen_flags: <defaults>
</compile_context>

<pallas_src>
import functools

import numpy as np
import jax
import jax.numpy as jnp
from jax.experimental import pallas as pl
from jax.experimental.pallas import tpu as pltpu


def rnn_unit_kernel(x_ref, wx_ref, wh_ref, bh_ref, h0_ref, out_ref, *, T, B):
    """x_ref: (T*B, M1) time-major/batch-inner.  out_ref: (T*B, M2)."""
    M2 = wh_ref.shape[1]

    # Input projection for all T*B rows at once on the MXU; bias add hoisted
    # off the serial chain (single broadcast VPU add).
    xwb = jnp.dot(x_ref[...], wx_ref[...],
                  preferred_element_type=jnp.float32) + bh_ref[...]   # (T*B, M2)

    wh = wh_ref[...]                                    # (M2, M2), loaded once
    hidden = jnp.broadcast_to(h0_ref[...], (B, M2))     # (B, M2), hoisted

    # Fully static unroll of the recurrence (T is small/static) so the
    # scheduler overlaps the MXU push/pop of step i with the VPU add/ReLU of
    # step i-1.  Each step's input block is a contiguous static slice.
    outs = []
    for i in range(T):
        pre = xwb[i * B:(i + 1) * B, :] + jnp.dot(
            hidden, wh, preferred_element_type=jnp.float32)
        hidden = jnp.maximum(pre, 0.0)                  # ReLU, (B, M2)
        outs.append(hidden)

    # One dense full-block store instead of T masked (B, M2) stores.
    out_ref[...] = jnp.concatenate(outs, axis=0).astype(out_ref.dtype)


def rnn_unit_forward(X, Wx, Wh, bh, h0):
    """X: (T, M1) single sequence (original module) or (B, T, M1) batched."""
    single = (X.ndim == 2)
    if single:
        X = X[None]                                     # (1, T, M1)
    B, T, M1 = X.shape
    M2 = Wx.shape[1]

    # Time-major, batch-inner flat layout: step i of the recurrence consumes
    # rows [i*B, (i+1)*B) of the projected input.  (Layout plumbing stays
    # outside the kernel.)
    x_flat = jnp.transpose(X, (1, 0, 2)).reshape(T * B, M1)
    bh2 = bh.reshape(1, M2)

    out_flat = pl.pallas_call(
        functools.partial(rnn_unit_kernel, T=T, B=B),
        out_shape=jax.ShapeDtypeStruct((T * B, M2), jnp.float32),
        # No grid: single invocation, full arrays resident in VMEM.
        in_specs=[pl.BlockSpec(memory_space=pltpu.MemorySpace.VMEM)] * 5,
        out_specs=pl.BlockSpec(memory_space=pltpu.MemorySpace.VMEM),
    )(x_flat, Wx, Wh, bh2, h0)

    out = jnp.transpose(out_flat.reshape(T, B, M2), (1, 0, 2))   # (B, T, M2)
    return out[0] if single else out


def rnn_unit_reference(X, Wx, Wh, bh, h0):
    if X.ndim == 3:
        return jnp.stack(
            [rnn_unit_reference(x, Wx, Wh, bh, h0) for x in X], axis=0)
    xw = X @ Wx
    hidden = h0
    outs = []
    for i in range(X.shape[0]):
        hidden = jnp.maximum(xw[i] + hidden @ Wh + bh, 0.0)      # (1, M2)
        outs.append(hidden[0])
    return jnp.stack(outs, axis=0)


if __name__ == "__main__":
    # Small shapes consistent with the module: seq=8, M1=16, M2=32, batch=8.
    T, M1, M2, B = 8, 16, 32, 8
    key = jax.random.PRNGKey(0)
    kx, kxb, kwx, kwh = jax.random.split(key, 4)

    # Deterministic parameter init mirroring the PyTorch __init__:
    #   Wx ~ randn(M1, M2) / sqrt(M1 + M2), Wh ~ randn(M2, M2) / sqrt(M1 + M2)
    #   bh = zeros(M2), h0 = zeros(1, M2)
    scale = 1.0 / np.sqrt(M1 + M2)
    Wx = jax.random.normal(kwx, (M1, M2), dtype=jnp.float32) * scale
    Wh = jax.random.normal(kwh, (M2, M2), dtype=jnp.float32) * scale
    bh = jnp.zeros((M2,), dtype=jnp.float32)
    h0 = jnp.zeros((1, M2), dtype=jnp.float32)

    # 1) Single sequence — exactly the PyTorch module's forward.
    X1 = jax.random.normal(kx, (T, M1), dtype=jnp.float32)
    out1 = jax.block_until_ready(rnn_unit_forward(X1, Wx, Wh, bh, h0))
    ref1 = rnn_unit_reference(X1, Wx, Wh, bh, h0)
    np.testing.assert_allclose(np.asarray(out1), np.asarray(ref1),
                               rtol=1e-5, atol=1e-5)

    # 2) Batched sequences — B independent chains share the MXU per step.
    XB = jax.random.normal(kxb, (B, T, M1), dtype=jnp.float32)
    outB = jax.block_until_ready(rnn_unit_forward(XB, Wx, Wh, bh, h0))
    refB = rnn_unit_reference(XB, Wx, Wh, bh, h0)
    np.testing.assert_allclose(np.asarray(outB), np.asarray(refB),
                               rtol=1e-5, atol=1e-5)

    print("KERNEL_OK")
</pallas_src>

<mosaic_0001>
module attributes {stable_mosaic.version = 11 : i64} {
  func.func @rnn_unit_kernel(%arg0: memref<8x16xf32, #tpu.memory_space<vmem>>, %arg1: memref<16x32xf32, #tpu.memory_space<vmem>>, %arg2: memref<32x32xf32, #tpu.memory_space<vmem>>, %arg3: memref<1x32xf32, #tpu.memory_space<vmem>>, %arg4: memref<1x32xf32, #tpu.memory_space<vmem>>, %arg5: memref<8x32xf32, #tpu.memory_space<vmem>>) attributes {dimension_semantics = [], scalar_prefetch = 0 : i64, scratch_operands = 0 : i64, tpu.core_type = #tpu.core_type<tc>} {
    %c0 = arith.constant 0 : index
    %c0_0 = arith.constant 0 : index
    %0 = vector.load %arg0[%c0, %c0_0] : memref<8x16xf32, #tpu.memory_space<vmem>>, vector<8x16xf32>
    %c0_1 = arith.constant 0 : index
    %c0_2 = arith.constant 0 : index
    %1 = vector.load %arg1[%c0_1, %c0_2] : memref<16x32xf32, #tpu.memory_space<vmem>>, vector<16x32xf32>
    %cst = arith.constant dense<0.000000e+00> : vector<8x32xf32>
    %2 = tpu.matmul %0, %1, %cst {dimension_numbers = #tpu.dot_dimension_numbers<[1], [0], [0], [1], [0, 0, 1, 1], [], []>} : vector<8x16xf32>, vector<16x32xf32>, vector<8x32xf32> -> vector<8x32xf32>
    %c0_3 = arith.constant 0 : index
    %c0_4 = arith.constant 0 : index
    %3 = vector.load %arg3[%c0_3, %c0_4] : memref<1x32xf32, #tpu.memory_space<vmem>>, vector<1x32xf32>
    %4 = vector.broadcast %3 : vector<1x32xf32> to vector<8x32xf32>
    %5 = arith.addf %2, %4 : vector<8x32xf32>
    %c0_5 = arith.constant 0 : index
    %c0_6 = arith.constant 0 : index
    %6 = vector.load %arg2[%c0_5, %c0_6] : memref<32x32xf32, #tpu.memory_space<vmem>>, vector<32x32xf32>
    %c0_7 = arith.constant 0 : index
    %c0_8 = arith.constant 0 : index
    %7 = vector.load %arg4[%c0_7, %c0_8] : memref<1x32xf32, #tpu.memory_space<vmem>>, vector<1x32xf32>
    %8 = vector.extract_strided_slice %5 {offsets = [0, 0], sizes = [1, 32], strides = [1, 1]} : vector<8x32xf32> to vector<1x32xf32>
    %cst_9 = arith.constant dense<0.000000e+00> : vector<1x32xf32>
    %9 = tpu.matmul %7, %6, %cst_9 {dimension_numbers = #tpu.dot_dimension_numbers<[1], [0], [0], [1], [0, 0, 1, 1], [], []>} : vector<1x32xf32>, vector<32x32xf32>, vector<1x32xf32> -> vector<1x32xf32>
    %10 = arith.addf %8, %9 : vector<1x32xf32>
    %cst_10 = arith.constant 0.000000e+00 : f32
    %11 = vector.broadcast %cst_10 : f32 to vector<1x32xf32>
    %12 = arith.maximumf %10, %11 : vector<1x32xf32>
    %13 = vector.extract_strided_slice %5 {offsets = [1, 0], sizes = [1, 32], strides = [1, 1]} : vector<8x32xf32> to vector<1x32xf32>
    %cst_11 = arith.constant dense<0.000000e+00> : vector<1x32xf32>
    %14 = tpu.matmul %12, %6, %cst_11 {dimension_numbers = #tpu.dot_dimension_numbers<[1], [0], [0], [1], [0, 0, 1, 1], [], []>} : vector<1x32xf32>, vector<32x32xf32>, vector<1x32xf32> -> vector<1x32xf32>
    %15 = arith.addf %13, %14 : vector<1x32xf32>
    %cst_12 = arith.constant 0.000000e+00 : f32
    %16 = vector.broadcast %cst_12 : f32 to vector<1x32xf32>
    %17 = arith.maximumf %15, %16 : vector<1x32xf32>
    %18 = vector.extract_strided_slice %5 {offsets = [2, 0], sizes = [1, 32], strides = [1, 1]} : vector<8x32xf32> to vector<1x32xf32>
    %cst_13 = arith.constant dense<0.000000e+00> : vector<1x32xf32>
    %19 = tpu.matmul %17, %6, %cst_13 {dimension_numbers = #tpu.dot_dimension_numbers<[1], [0], [0], [1], [0, 0, 1, 1], [], []>} : vector<1x32xf32>, vector<32x32xf32>, vector<1x32xf32> -> vector<1x32xf32>
    %20 = arith.addf %18, %19 : vector<1x32xf32>
    %cst_14 = arith.constant 0.000000e+00 : f32
    %21 = vector.broadcast %cst_14 : f32 to vector<1x32xf32>
    %22 = arith.maximumf %20, %21 : vector<1x32xf32>
    %23 = vector.extract_strided_slice %5 {offsets = [3, 0], sizes = [1, 32], strides = [1, 1]} : vector<8x32xf32> to vector<1x32xf32>
    %cst_15 = arith.constant dense<0.000000e+00> : vector<1x32xf32>
    %24 = tpu.matmul %22, %6, %cst_15 {dimension_numbers = #tpu.dot_dimension_numbers<[1], [0], [0], [1], [0, 0, 1, 1], [], []>} : vector<1x32xf32>, vector<32x32xf32>, vector<1x32xf32> -> vector<1x32xf32>
    %25 = arith.addf %23, %24 : vector<1x32xf32>
    %cst_16 = arith.constant 0.000000e+00 : f32
    %26 = vector.broadcast %cst_16 : f32 to vector<1x32xf32>
    %27 = arith.maximumf %25, %26 : vector<1x32xf32>
    %28 = vector.extract_strided_slice %5 {offsets = [4, 0], sizes = [1, 32], strides = [1, 1]} : vector<8x32xf32> to vector<1x32xf32>
    %cst_17 = arith.constant dense<0.000000e+00> : vector<1x32xf32>
    %29 = tpu.matmul %27, %6, %cst_17 {dimension_numbers = #tpu.dot_dimension_numbers<[1], [0], [0], [1], [0, 0, 1, 1], [], []>} : vector<1x32xf32>, vector<32x32xf32>, vector<1x32xf32> -> vector<1x32xf32>
    %30 = arith.addf %28, %29 : vector<1x32xf32>
    %cst_18 = arith.constant 0.000000e+00 : f32
    %31 = vector.broadcast %cst_18 : f32 to vector<1x32xf32>
    %32 = arith.maximumf %30, %31 : vector<1x32xf32>
    %33 = vector.extract_strided_slice %5 {offsets = [5, 0], sizes = [1, 32], strides = [1, 1]} : vector<8x32xf32> to vector<1x32xf32>
    %cst_19 = arith.constant dense<0.000000e+00> : vector<1x32xf32>
    %34 = tpu.matmul %32, %6, %cst_19 {dimension_numbers = #tpu.dot_dimension_numbers<[1], [0], [0], [1], [0, 0, 1, 1], [], []>} : vector<1x32xf32>, vector<32x32xf32>, vector<1x32xf32> -> vector<1x32xf32>
    %35 = arith.addf %33, %34 : vector<1x32xf32>
    %cst_20 = arith.constant 0.000000e+00 : f32
    %36 = vector.broadcast %cst_20 : f32 to vector<1x32xf32>
    %37 = arith.maximumf %35, %36 : vector<1x32xf32>
    %38 = vector.extract_strided_slice %5 {offsets = [6, 0], sizes = [1, 32], strides = [1, 1]} : vector<8x32xf32> to vector<1x32xf32>
    %cst_21 = arith.constant dense<0.000000e+00> : vector<1x32xf32>
    %39 = tpu.matmul %37, %6, %cst_21 {dimension_numbers = #tpu.dot_dimension_numbers<[1], [0], [0], [1], [0, 0, 1, 1], [], []>} : vector<1x32xf32>, vector<32x32xf32>, vector<1x32xf32> -> vector<1x32xf32>
    %40 = arith.addf %38, %39 : vector<1x32xf32>
    %cst_22 = arith.constant 0.000000e+00 : f32
    %41 = vector.broadcast %cst_22 : f32 to vector<1x32xf32>
    %42 = arith.maximumf %40, %41 : vector<1x32xf32>
    %43 = vector.extract_strided_slice %5 {offsets = [7, 0], sizes = [1, 32], strides = [1, 1]} : vector<8x32xf32> to vector<1x32xf32>
    %cst_23 = arith.constant dense<0.000000e+00> : vector<1x32xf32>
    %44 = tpu.matmul %42, %6, %cst_23 {dimension_numbers = #tpu.dot_dimension_numbers<[1], [0], [0], [1], [0, 0, 1, 1], [], []>} : vector<1x32xf32>, vector<32x32xf32>, vector<1x32xf32> -> vector<1x32xf32>
    %45 = arith.addf %43, %44 : vector<1x32xf32>
    %cst_24 = arith.constant 0.000000e+00 : f32
    %46 = vector.broadcast %cst_24 : f32 to vector<1x32xf32>
    %47 = arith.maximumf %45, %46 : vector<1x32xf32>
    %48 = tpu.concatenate %12, %17, %22, %27, %32, %37, %42, %47 in 0 : vector<1x32xf32>, vector<1x32xf32>, vector<1x32xf32>, vector<1x32xf32>, vector<1x32xf32>, vector<1x32xf32>, vector<1x32xf32>, vector<1x32xf32> -> vector<8x32xf32>
    %c0_25 = arith.constant 0 : index
    %c0_26 = arith.constant 0 : index
    %49 = vector.load %arg5[%c0_25, %c0_26] : memref<8x32xf32, #tpu.memory_space<vmem>>, vector<8x32xf32>
    tpu.vector_store %arg5[%c0_25, %c0_26], %48 {strides = array<i32>} : memref<8x32xf32, #tpu.memory_space<vmem>>, vector<8x32xf32>,
    return
  }
}

</mosaic_0001>

<bundles_post_ra>
// kernel: tpu_custom_call.1
= control target key start
LH: loop header
LB: loop body
LE: loop exit
PB: predicated region body
PF: predicated region fallthrough
CT: control target
= control target key end

     0   :  { %10 = vsyncpa [#allocation3], 0  ;;  %s1283_s0 = inlined_call_operand.hbm [shape: f32[8,16], index: 0, kind: input, shape index: {}]   ;;  %s1284_s1 = inlined_call_operand.hbm [shape: f32[16,32], index: 1, kind: input, shape index: {}]   ;;  %s1285_s2 = inlined_call_operand.hbm [shape: f32[32,32], index: 2, kind: input, shape index: {}]   ;;  %s1286_s3 = inlined_call_operand.vmem [shape: f32[1,32], index: 3, kind: input, shape index: {}]   ;;  %s1287_s4 = inlined_call_operand.vmem [shape: f32[1,32], index: 4, kind: input, shape index: {}]   ;;  %s1288_s5 = inlined_call_operand.hbm [shape: f32[8,32], index: 5, kind: output, shape index: {}]  }
   0x1   :  { %11 = vsyncpa [#allocation6], 0 }
   0x2   :  { %12 = vsyncpa [#allocation4], 0  ;;  %s1110_s18 = smov [#allocation5]   ;;  %s1016_s22 = scalar_lea.hbm %s1284_s1, 256 }
   0x3   :  { %s28_s19 = sshll.u32 %s1110_s18, 4  ;;  %p1017_p0 = scmp.ne.s32.totalorder %s1284_s1, %s1016_s22  ;;  %s29_s19 = int_to_ptr.vmem [resolvable:$true] %s28_s19 }
   0x4   :  { %p1020_p1 = scmp.lt.u32.totalorder %s1016_s22, %s1284_s1 }
   0x6   :  { %p1022_p2 = pnand %p1020_p1, %p1017_p0 }
   0x8   :  { %1025 = shalt.err (!%p1022_p2)
}
   0x9   :  { %s1026_s27 = scalar_lea.vmem %s29_s19, 256  ;;  %p1031_p4 = scmp.lt.s32.totalorder %s29_s19, %s29_s19 }
   0xa   :  { %p1027_p3 = scmp.ne.s32.totalorder %s29_s19, %s1026_s27  ;;  %p1032_p5 = scmp.lt.s32.totalorder %s1026_s27, %s1026_s27 }
   0xc   :  { %p1033_p6 = por %p1032_p5, %p1031_p4 }
   0xe   :  { %p1034_p7 = pnand %p1033_p6, %p1027_p3 }
  0x10   :  { %1037 = shalt.err (!%p1034_p7)
}
  0x11   :  { %s1111_s28 = smov 128   ;;  %s1112_s29 = smov 8  }
  0x12   :  { %34 = dma.hbm_to_vmem [thread:$0]  %s1284_s1, 256, %s29_s19, [#allocation6], %s1111_s28, %s1111_s28, %s1112_s29  }
  0x13   :  { %s1113_s7 = smov [#allocation2]   ;;  %s1114_s9 = smov [#allocation7]  }
  0x14   :  { %s19_s8 = sshll.u32 %s1113_s7, 4  ;;  %s40_s10 = sshll.u32 %s1114_s9, 4  ;;  %s20_s8 = int_to_ptr.vmem [resolvable:$true] %s19_s8  ;;  %s41_s10 = int_to_ptr.vmem [resolvable:$true] %s40_s10 }
  0x15   :  { %s1038_s13 = scalar_lea.hbm %s1283_s0, 128 }
  0x16   :  { %p1039_p8 = scmp.ne.s32.totalorder %s1283_s0, %s1038_s13  ;;  %p1042_p9 = scmp.lt.u32.totalorder %s1038_s13, %s1283_s0 }
  0x18   :  { %p1044_p10 = pnand %p1042_p9, %p1039_p8 }
  0x1a   :  { %1047 = shalt.err (!%p1044_p10)
}
  0x1b   :  { %s1048_s1 = scalar_lea.vmem %s20_s8, 128  ;;  %p1053_p12 = scmp.lt.s32.totalorder %s20_s8, %s20_s8 }
  0x1c   :  { %p1049_p11 = scmp.ne.s32.totalorder %s20_s8, %s1048_s1  ;;  %p1054_p13 = scmp.lt.s32.totalorder %s1048_s1, %s1048_s1 }
  0x1e   :  { %p1055_p0 = por %p1054_p13, %p1053_p12 }
  0x20   :  { %p1056_p1 = pnand %p1055_p0, %p1049_p11 }
  0x22   :  { %1059 = shalt.err (!%p1056_p1)
}
  0x23   :  { %22 = dma.hbm_to_vmem [thread:$0]  %s1283_s0, 128, %s20_s8, [#allocation3]  }
  0x24   :  { %s1060_s22 = scalar_lea.hbm %s1285_s2, 512 }
  0x25   :  { %p1061_p2 = scmp.ne.s32.totalorder %s1285_s2, %s1060_s22  ;;  %p1064_p3 = scmp.lt.u32.totalorder %s1060_s22, %s1285_s2 }
  0x27   :  { %p1066_p4 = pnand %p1064_p3, %p1061_p2 }
  0x29   :  { %1069 = shalt.err (!%p1066_p4)
}
  0x2a   :  { %s1070_s27 = scalar_lea.vmem %s41_s10, 512  ;;  %p1075_p6 = scmp.lt.s32.totalorder %s41_s10, %s41_s10 }
  0x2b   :  { %p1071_p5 = scmp.ne.s32.totalorder %s41_s10, %s1070_s27  ;;  %p1076_p7 = scmp.lt.s32.totalorder %s1070_s27, %s1070_s27 }
  0x2d   :  { %p1077_p8 = por %p1076_p7, %p1075_p6 }
  0x2f   :  { %p1078_p9 = pnand %p1077_p8, %p1071_p5 }
  0x31   :  { %1081 = shalt.err (!%p1078_p9)
}
  0x32   :  { %46 = dma.hbm_to_vmem [thread:$0]  %s1285_s2, 512, %s41_s10, [#allocation6], %s1111_s28, %s1111_s28, %s1112_s29  }
  0x33   :  { %1104 = dma.done.wait [#allocation3], 128  }
  0x34   :  { %1105 = vsyncadd [#allocation3], 4294967168 }
  0x35   :  { %1106 = dma.done.wait [#allocation6], 768  }
  0x36   :  { %1107 = vsyncadd [#allocation6], 4294966528  ;;  %v1115_v0 = vmov 0.0|0.0   ;;  %vm1116_vm0 = vmmov 0   ;;  %v1117_v1 = vmov 0.0   ;;  %v144_v2 = vld [vmem:[#allocation7] sm:$0xff] }
  0x37   :  { %959 = vmatprep.subr.bf16.mxu1 %v1115_v0  ;;  %956 = vmatprep.subr.bf16.mxu0 %v1115_v0  ;;  %v145_v3 = vld [vmem:[#allocation7 + $0x8] sm:$0xff]  ;;  %v61_v4 = vld [vmem:[#allocation5] sm:$0xff]  ;;  %v62_v6 = vld [vmem:[#allocation5 + $0x8] sm:$0xff]  ;;  %vm70_vm1 = vcmask 130048   ;;  %vm149_vm2 = vcmask 261120   ;;  %vm777_vm3 = vcmask 1040384  }
  0x38   :  { %865 = vmatprep.mubr.msk.f32.mxu0 %vm1116_vm0, %v1117_v1  ;;  %876 = vmatprep.mubr.msk.f32.mxu1 %vm1116_vm0, %v1117_v1  ;;  %v1197_v5 = vpack.c.bf16 %v145_v3, %v144_v2  ;;  %v146_v7 = vld [vmem:[#allocation7 + $0x10] sm:$0xff]  ;;  %v957_v8 = vpack.c.bf16 %v62_v6, %v61_v4  ;;  %v147_v9 = vld [vmem:[#allocation7 + $0x18] sm:$0xff]  ;;  %v60_v11 = vld [vmem:[#allocation2] sm:$0xff]  ;;  %vm779_vm4 = vcmask 1041408   ;;  %vm781_vm5 = vcmask 1042432  }
  0x39   :  { %v1200_v10 = vpack.c.bf16 %v147_v9, %v146_v7  ;;  %v148_v12 = vld [vmem:[%s1287_s4] sm:$0x1]  ;;  %vm783_vm6 = vcmask 1043456   ;;  %vm785_vm7 = vcmask 1044480   ;;  %vm787_vm8 = vcmask 1045504  }
  0x3a   :  { %961 = vmatpush3.bf16.msra.mxu1 %v1197_v5  ;;  %958 = vmatpush3.bf16.msra.mxu0 %v957_v8  ;;  %v808_v13 = vld [vmem:[%s1286_s3] ss:$0 sm:$0xff]  ;;  %s1118_s3 = smov [#allocation8]   ;;  %vm789_vm9 = vcmask 1046528  }
  0x3b   :  { %962 = vmatprep.subr.bf16.mxu1 %v1115_v0  ;;  %965 = vmatprep.subr.bf16.mxu0 %v1115_v0  ;;  %s798_s6 = sshll.u32 %s1118_s3, 4  ;;  %s799_s6 = int_to_ptr.vmem [resolvable:$true] %s798_s6 }
  0x3c   :  { %s1082_s7 = scalar_lea.vmem %s799_s6, 128  ;;  %p1087_p11 = scmp.lt.s32.totalorder %s799_s6, %s799_s6 }
  0x3d   :  { %866 = vmatmul.mubr.msk.f32.vlgmr.msra.gmra.mrb[0].mxu0 %vm70_vm1, %v60_v11  ;;  %p1083_p10 = scmp.ne.s32.totalorder %s799_s6, %s1082_s7  ;;  %p1088_p12 = scmp.lt.s32.totalorder %s1082_s7, %s1082_s7 }
  0x3e   :  { %964 = vmatpush3.bf16.msra.mxu1 %v1200_v10  ;;  %967 = vmatpush3.bf16.msra.mxu0 %v1197_v5 }
  0x3f   :  { %887 = vmatprep.mubr.msk.f32.mxu0 %vm1116_vm0, %v1117_v1  ;;  %968 = vmatprep.subr.bf16.mxu0 %v1115_v0  ;;  %p1089_p13 = por %p1088_p12, %p1087_p11 }
  0x40   :  { %971 = vmatprep.subr.bf16.mxu1 %v1115_v0 }
  0x41   :  { %877 = vmatmul.mubr.msk.f32.vlgmr.msra.gmra.mrb[0].mxu1 %vm149_vm2, %v148_v12  ;;  %p1090_p0 = pnand %p1089_p13, %p1083_p10 }
  0x42   :  { %973 = vmatpush3.bf16.msra.mxu1 %v1197_v5  ;;  %898 = vmatprep.mubr.msk.f32.mxu1 %vm1116_vm0, %v1117_v1 }
  0x43   :  { %970 = vmatpush3.bf16.msra.mxu0 %v1200_v10  ;;  %974 = vmatprep.subr.bf16.mxu1 %v1115_v0 }
  0x44   :  { %977 = vmatprep.subr.bf16.mxu0 %v1115_v0 }
  0x46   :  { %976 = vmatpush3.bf16.msra.mxu1 %v1200_v10 }
  0x47   :  { %983 = vmatprep.subr.bf16.mxu1 %v1115_v0 }
 0x110   :  { %v140_v14 = vpop.f32.mrb[0].mxu0 }
 0x111   :  { %v1225_v15 = vadd.f32 %v808_v13, %v140_v14  ;;  %v867_v16 = vpop.f32.mrb[1].mxu0 }
 0x114   :  { %v219_v17 = vpop.f32.mrb[0].mxu1 }
 0x115   :  { %v223_v18 = vadd.f32 %v219_v17, %v1225_v15  ;;  %v878_v19 = vpop.f32.mrb[1].mxu1 }
 0x117   :  { %v224_v20 = vmax.f32 %v223_v18, 0.0 }
 0x119   :  { %888 = vmatmul.mubr.msk.f32.vlgmr.msra.gmra.mrb[2].mxu0 %vm149_vm2, %v224_v20 }
 0x11a   :  { %979 = vmatpush3.bf16.msra.mxu0 %v1197_v5  ;;  %909 = vmatprep.mubr.msk.f32.mxu0 %vm1116_vm0, %v1117_v1 }
 0x11b   :  { %980 = vmatprep.subr.bf16.mxu0 %v1115_v0 }
 0x11e   :  { %982 = vmatpush3.bf16.msra.mxu0 %v1200_v10 }
 0x11f   :  { %989 = vmatprep.subr.bf16.mxu0 %v1115_v0 }
 0x1ec   :  { %v294_v21 = vpop.f32.mrb[2].mxu0 }
 0x1ed   :  { %v299_v22 = vrot.slane %v294_v21, 7  ;;  %v889_v23 = vpop.f32.mrb[3].mxu0 }
 0x1ef   :  { %v301_v24 = vadd.f32 %v299_v22, %v1225_v15 }
 0x1f1   :  { %v302_v25 = vmax.f32 %v301_v24, 0.0 }
 0x1f3   :  { %v304_v26 = vrot.slane %v302_v25, 1  ;;  %v778_v32 = vsel %vm777_vm3, %v224_v20, %v302_v25 }
 0x1f5   :  { %899 = vmatmul.mubr.msk.f32.vlgmr.msra.gmra.mrb[2].mxu1 %vm149_vm2, %v304_v26 }
 0x1f6   :  { %985 = vmatpush3.bf16.msra.mxu1 %v1197_v5  ;;  %920 = vmatprep.mubr.msk.f32.mxu1 %vm1116_vm0, %v1117_v1 }
 0x1f7   :  { %986 = vmatprep.subr.bf16.mxu1 %v1115_v0 }
 0x1fa   :  { %988 = vmatpush3.bf16.msra.mxu1 %v1200_v10 }
 0x1fb   :  { %995 = vmatprep.subr.bf16.mxu1 %v1115_v0 }
 0x2c8   :  { %v373_v27 = vpop.f32.mrb[2].mxu1 }
 0x2c9   :  { %v378_v28 = vrot.slane %v373_v27, 6  ;;  %v900_v29 = vpop.f32.mrb[3].mxu1 }
 0x2cb   :  { %v380_v30 = vadd.f32 %v378_v28, %v1225_v15 }
 0x2cd   :  { %v381_v31 = vmax.f32 %v380_v30, 0.0 }
 0x2cf   :  { %v383_v33 = vrot.slane %v381_v31, 2  ;;  %v780_v34 = vsel %vm779_vm4, %v778_v32, %v381_v31 }
 0x2d1   :  { %910 = vmatmul.mubr.msk.f32.vlgmr.msra.gmra.mrb[4].mxu0 %vm149_vm2, %v383_v33 }
 0x2d2   :  { %991 = vmatpush3.bf16.msra.mxu0 %v1197_v5  ;;  %931 = vmatprep.mubr.msk.f32.mxu0 %vm1116_vm0, %v1117_v1 }
 0x2d3   :  { %992 = vmatprep.subr.bf16.mxu0 %v1115_v0 }
 0x2d6   :  { %994 = vmatpush3.bf16.msra.mxu0 %v1200_v10 }
 0x2d7   :  { %1001 = vmatprep.subr.bf16.mxu0 %v1115_v0 }
 0x3a4   :  { %v452_v35 = vpop.f32.mrb[4].mxu0 }
 0x3a5   :  { %v457_v36 = vrot.slane %v452_v35, 5  ;;  %v911_v37 = vpop.f32.mrb[5].mxu0 }
 0x3a7   :  { %v459_v38 = vadd.f32 %v457_v36, %v1225_v15 }
 0x3a9   :  { %v460_v39 = vmax.f32 %v459_v38, 0.0 }
 0x3ab   :  { %v462_v40 = vrot.slane %v460_v39, 3  ;;  %v782_v41 = vsel %vm781_vm5, %v780_v34, %v460_v39 }
 0x3ad   :  { %921 = vmatmul.mubr.msk.f32.vlgmr.msra.gmra.mrb[4].mxu1 %vm149_vm2, %v462_v40 }
 0x3ae   :  { %997 = vmatpush3.bf16.msra.mxu1 %v1197_v5  ;;  %942 = vmatprep.mubr.msk.f32.mxu1 %vm1116_vm0, %v1117_v1 }
 0x3af   :  { %998 = vmatprep.subr.bf16.mxu1 %v1115_v0 }
 0x3b2   :  { %1000 = vmatpush3.bf16.msra.mxu1 %v1200_v10 }
 0x480   :  { %v531_v42 = vpop.f32.mrb[4].mxu1 }
 0x481   :  { %v536_v43 = vrot.slane %v531_v42, 4  ;;  %v922_v44 = vpop.f32.mrb[5].mxu1 }
 0x483   :  { %v538_v45 = vadd.f32 %v536_v43, %v1225_v15 }
 0x485   :  { %v539_v46 = vmax.f32 %v538_v45, 0.0 }
 0x487   :  { %v541_v47 = vrot.slane %v539_v46, 4  ;;  %v784_v48 = vsel %vm783_vm6, %v782_v41, %v539_v46 }
 0x489   :  { %932 = vmatmul.mubr.msk.f32.vlgmr.msra.gmra.mrb[6].mxu0 %vm149_vm2, %v541_v47 }
 0x48a   :  { %1003 = vmatpush3.bf16.msra.mxu0 %v1197_v5  ;;  %953 = vmatprep.mubr.msk.f32.mxu0 %vm1116_vm0, %v1117_v1 }
 0x48b   :  { %1004 = vmatprep.subr.bf16.mxu0 %v1115_v0 }
 0x48e   :  { %1006 = vmatpush3.bf16.msra.mxu0 %v1200_v10 }
 0x55c   :  { %v610_v49 = vpop.f32.mrb[6].mxu0 }
 0x55d   :  { %v615_v50 = vrot.slane %v610_v49, 3  ;;  %v933_v51 = vpop.f32.mrb[7].mxu0 }
 0x55f   :  { %v617_v52 = vadd.f32 %v615_v50, %v1225_v15 }
 0x561   :  { %v618_v53 = vmax.f32 %v617_v52, 0.0 }
 0x563   :  { %v620_v54 = vrot.slane %v618_v53, 5  ;;  %v786_v55 = vsel %vm785_vm7, %v784_v48, %v618_v53 }
 0x565   :  { %943 = vmatmul.mubr.msk.f32.vlgmr.msra.gmra.mrb[6].mxu1 %vm149_vm2, %v620_v54 }
 0x638   :  { %v689_v56 = vpop.f32.mrb[6].mxu1 }
 0x639   :  { %v694_v57 = vrot.slane %v689_v56, 2  ;;  %v944_v58 = vpop.f32.mrb[7].mxu1 }
 0x63b   :  { %v696_v59 = vadd.f32 %v694_v57, %v1225_v15 }
 0x63d   :  { %v697_v60 = vmax.f32 %v696_v59, 0.0 }
 0x63f   :  { %v699_v61 = vrot.slane %v697_v60, 6  ;;  %v788_v62 = vsel %vm787_vm8, %v786_v55, %v697_v60 }
 0x641   :  { %954 = vmatmul.mubr.msk.f32.vlgmr.msra.gmra.mrb[8].mxu0 %vm149_vm2, %v699_v61 }
 0x714   :  { %v768_v63 = vpop.f32.mrb[8].mxu0 }
 0x715   :  { %v773_v0 = vrot.slane %v768_v63, 1  ;;  %v955_v1 = vpop.f32.mrb[9].mxu0 }
 0x717   :  { %v775_v2 = vadd.f32 %v773_v0, %v1225_v15 }
 0x719   :  { %v776_v3 = vmax.f32 %v775_v2, 0.0 }
 0x71b   :  { %v790_v4 = vsel %vm789_vm9, %v788_v62, %v776_v3 }
 0x71c   :  { %791 = vst.msk [vmem:[#allocation8] sm:$0xff] %vm149_vm2, %v790_v4 }
 0x71d   :  { %1093 = shalt.err (!%p1090_p0)
}
 0x71e   :  { %s1094_s10 = scalar_lea.hbm %s1288_s5, 128 }
 0x71f   :  { %p1095_p1 = scmp.ne.s32.totalorder %s1288_s5, %s1094_s10  ;;  %p1098_p2 = scmp.lt.u32.totalorder %s1094_s10, %s1288_s5 }
 0x721   :  { %p1100_p3 = pnand %p1098_p2, %p1095_p1 }
 0x723   :  { %1103 = shalt.err (!%p1100_p3)
}
 0x724   :  { %801 = dma.vmem_to_hbm [thread:$0]  %s799_s6, 128, %s1288_s5, [#allocation4]  }
 0x725   :  { %1108 = dma.done.wait [#allocation4], 128  }
 0x726   :  { %1109 = vsyncadd [#allocation4], 4294967168 }
 0x727   :  { %805 = vsyncpa [#allocation3], 1 }
 0x728   :  { %806 = vsyncpa [#allocation6], 1 }
 0x729   :  { %807 = vsyncpa [#allocation4], 1 }

</bundles_post_ra>
